<compile_context>
chip_gen: v5e
topology: v5e:2x2
jax: 0.10.0
libtpu: 0.0.40
codegen_flags: <defaults>
</compile_context>

<pallas_src>
import functools

import jax
import jax.numpy as jnp
from jax import lax
from jax.experimental import pallas as pl
from jax.experimental.pallas import tpu as pltpu


def _flash_attention_kernel(xq_ref, xk_ref, wq_ref, wk_ref, wv_ref, wo_ref,
                            o_ref, q_sc, m_sc, l_sc, acc_sc, out_sc, *,
                            d_v, tile_q, tile_k, use_future_mask):
    """Grid = (batch, q_block, head, kv_block).

    xq_ref : (1, tile_q, D) bf16   query-row view of x
    xk_ref : (1, tile_k, D) bf16   key/value-row view of x
    w{q,k,v}_ref : (1, D, d_v) bf16  head-h slice of Wq/Wk/Wv
    wo_ref : (1, d_v, D) bf16        head-h rows of Wo
    o_ref  : (1, tile_q, D)          output block (resident across head/kv axes)

    q_sc   : (tile_q, d_v) bf16    scaled q for the current head
    m_sc   : (tile_q, 1)   f32     online-softmax running max
    l_sc   : (tile_q, 1)   f32     online-softmax running denominator
    acc_sc : (tile_q, d_v) f32     unnormalised p @ v accumulator
    out_sc : (tile_q, D)   f32     output-projection accumulator across heads
    """
    qi = pl.program_id(1)
    h = pl.program_id(2)
    ki = pl.program_id(3)
    n_h = pl.num_programs(2)
    n_k = pl.num_programs(3)

    # --- per (batch, q_block): zero the output-projection accumulator ---------
    @pl.when((h == 0) & (ki == 0))
    def _():
        out_sc[...] = jnp.zeros_like(out_sc)

    # --- per (batch, q_block, head): project q once, reset softmax state ------
    @pl.when(ki == 0)
    def _():
        qh = jnp.dot(xq_ref[0], wq_ref[0], preferred_element_type=jnp.float32)
        # Fold 1/sqrt(d_v) into q once (tile_q*d_v multiplies, not S^2 divides).
        q_sc[...] = (qh * jnp.float32(1.0 / float(d_v) ** 0.5)).astype(q_sc.dtype)
        m_sc[...] = jnp.full_like(m_sc, -jnp.inf)
        l_sc[...] = jnp.zeros_like(l_sc)
        acc_sc[...] = jnp.zeros_like(acc_sc)

    # --- project this head's K/V chunk (bf16 operands, f32 accumulation) ------
    xk = xk_ref[0]                                                    # (tile_k, D)
    kh = jnp.dot(xk, wk_ref[0], preferred_element_type=jnp.float32)   # (tile_k, d_v)
    vh = jnp.dot(xk, wv_ref[0], preferred_element_type=jnp.float32)   # (tile_k, d_v)

    # scores = q @ k^T, contracting the last dims (no explicit relayout of kh).
    # If the Mosaic dump shows a per-block vxpose here, it rides the XLU slot
    # (separate from the MXU) -- revisit only if the XLU is the saturated unit.
    s = lax.dot_general(q_sc[...], kh.astype(jnp.bfloat16),
                        (((1,), (1,)), ((), ())),
                        preferred_element_type=jnp.float32)           # (tile_q, tile_k)

    if use_future_mask:
        # PyTorch semantics: masked entries are SET to -100 before softmax.
        row = qi * tile_q + lax.broadcasted_iota(jnp.int32, (tile_q, tile_k), 0)
        col = ki * tile_k + lax.broadcasted_iota(jnp.int32, (tile_q, tile_k), 1)
        s = jnp.where(row < col, jnp.float32(-100.0), s)

    # --- online-softmax update (elementwise math kept in f32) -----------------
    m_prev = m_sc[...]
    m_new = jnp.maximum(m_prev, jnp.max(s, axis=-1, keepdims=True))
    alpha = jnp.exp(m_prev - m_new)
    p = jnp.exp(s - m_new)                                            # (tile_q, tile_k)
    l_sc[...] = alpha * l_sc[...] + jnp.sum(p, axis=-1, keepdims=True)
    acc_sc[...] = alpha * acc_sc[...] + jnp.dot(
        p.astype(jnp.bfloat16), vh.astype(jnp.bfloat16),
        preferred_element_type=jnp.float32)
    m_sc[...] = m_new

    # --- head finished: normalise and fold through this head's Wo rows --------
    @pl.when(ki == n_k - 1)
    def _():
        # Normalise AFTER p@v (tile_q*d_v elementwise; reciprocal on the EUP).
        ctx = acc_sc[...] * pl.reciprocal(l_sc[...], approx=True)
        out_sc[...] += jnp.dot(ctx.astype(jnp.bfloat16), wo_ref[0],
                               preferred_element_type=jnp.float32)

    # --- all heads + all KV blocks done: emit the output block ----------------
    @pl.when((ki == n_k - 1) & (h == n_h - 1))
    def _():
        o_ref[0] = out_sc[...].astype(o_ref.dtype)


def prepare_attention_weights(wq, wk, wv, wo, *, num_heads):
    """One-time weight restructure + bf16 cast (hoisted out of the call path).

    wq/wk/wv/wo are (in, out) matrices, i.e. y = x @ W (nn.Linear, bias=False).
    Returns head-major slices: wq/wk/wv -> (H, D, d_v), wo -> (H, d_v, D).
    """
    d_model = wq.shape[0]
    assert d_model % num_heads == 0
    d_v = d_model // num_heads

    def per_head_in(w):                       # (D, D) -> (H, D, d_v)
        return (w.reshape(d_model, num_heads, d_v)
                 .transpose(1, 0, 2).astype(jnp.bfloat16))

    wq_h = per_head_in(wq)
    wk_h = per_head_in(wk)
    wv_h = per_head_in(wv)
    wo_h = wo.reshape(num_heads, d_v, d_model).astype(jnp.bfloat16)   # (H, d_v, D)
    return wq_h, wk_h, wv_h, wo_h


def _pick_tile(n, target):
    """Largest divisor of n that is <= target and sublane-friendly (mult. of 8),
    falling back to the full extent."""
    for cand in range(min(n, target), 0, -1):
        if n % cand == 0 and (cand % 8 == 0 or cand == n):
            return cand
    return n


def _round_up(n, m):
    return (n + m - 1) // m * m


def _vmem_limit_bytes(tile_q, tile_k, d_model, d_v):
    """Explicit scoped-VMEM budget from (8,128)-padded block/scratch/temp sizes."""
    def pad(r, c, itemsize):
        return _round_up(r, 8) * _round_up(c, 128) * itemsize

    # double-buffered pipeline blocks (bf16 inputs, f32 output)
    blocks = 2 * (pad(tile_q, d_model, 2) + pad(tile_k, d_model, 2)
                  + 3 * pad(d_model, d_v, 2) + pad(d_v, d_model, 2)
                  + pad(tile_q, d_model, 4))
    # persistent scratch
    scratch = (pad(tile_q, d_v, 2) + 2 * pad(tile_q, 1, 4)
               + pad(tile_q, d_v, 4) + pad(tile_q, d_model, 4))
    # in-body temporaries (scores/p, projected K/V chunk) with slack
    temps = 3 * pad(tile_q, tile_k, 4) + 4 * pad(tile_k, d_v, 4)
    need = blocks + scratch + temps
    return int(min(max(2 * need, 32 * 1024 * 1024), 100 * 1024 * 1024))


def attention_pallas(x, weights, *, num_heads, use_future_mask=False,
                     q_block_target=128, kv_block_target=512):
    """x: (bs, S, D); weights from prepare_attention_weights (head-major bf16)."""
    wq_h, wk_h, wv_h, wo_h = weights
    bs, seq_len, d_model = x.shape
    assert d_model % num_heads == 0
    d_v = d_model // num_heads

    # Tiles re-derived from targets so the live set fits every generation
    # (128-256 q rows, 512-ish KV columns; shrinks automatically at small S).
    tile_q = _pick_tile(seq_len, q_block_target)
    tile_k = _pick_tile(seq_len, kv_block_target)
    n_q = seq_len // tile_q
    n_k = seq_len // tile_k

    x_bf16 = x.astype(jnp.bfloat16)   # bf16 MXU operands; halves x HBM traffic.

    kernel = functools.partial(
        _flash_attention_kernel, d_v=d_v, tile_q=tile_q, tile_k=tile_k,
        use_future_mask=use_future_mask)

    return pl.pallas_call(
        kernel,
        out_shape=jax.ShapeDtypeStruct((bs, seq_len, d_model), x.dtype),
        grid=(bs, n_q, num_heads, n_k),
        in_specs=[
            # query-row view of x
            pl.BlockSpec((1, tile_q, d_model), lambda b, qi, h, ki: (b, qi, 0)),
            # key/value-row view of x
            pl.BlockSpec((1, tile_k, d_model), lambda b, qi, h, ki: (b, ki, 0)),
            # per-head weight slices: DMA-level head slicing, one head resident
            pl.BlockSpec((1, d_model, d_v), lambda b, qi, h, ki: (h, 0, 0)),
            pl.BlockSpec((1, d_model, d_v), lambda b, qi, h, ki: (h, 0, 0)),
            pl.BlockSpec((1, d_model, d_v), lambda b, qi, h, ki: (h, 0, 0)),
            pl.BlockSpec((1, d_v, d_model), lambda b, qi, h, ki: (h, 0, 0)),
        ],
        out_specs=pl.BlockSpec((1, tile_q, d_model),
                               lambda b, qi, h, ki: (b, qi, 0)),
        scratch_shapes=[
            pltpu.VMEM((tile_q, d_v), jnp.bfloat16),     # q (scaled)
            pltpu.VMEM((tile_q, 1), jnp.float32),        # m (running max)
            pltpu.VMEM((tile_q, 1), jnp.float32),        # l (running denom)
            pltpu.VMEM((tile_q, d_v), jnp.float32),      # p @ v accumulator
            pltpu.VMEM((tile_q, d_model), jnp.float32),  # output-projection acc
        ],
        compiler_params=pltpu.CompilerParams(
            dimension_semantics=("parallel", "parallel", "arbitrary", "arbitrary"),
            vmem_limit_bytes=_vmem_limit_bytes(tile_q, tile_k, d_model, d_v)),
    )(x_bf16, x_bf16, wq_h, wk_h, wv_h, wo_h)


def attention_ref(x, wq, wk, wv, wo, *, num_heads, use_future_mask=False):
    """Plain-JAX f32 reference replicating the PyTorch forward."""
    bs, s, d = x.shape
    d_v = d // num_heads
    q = (x @ wq).reshape(bs, s, num_heads, d_v).transpose(0, 2, 1, 3)
    k = (x @ wk).reshape(bs, s, num_heads, d_v).transpose(0, 2, 1, 3)
    v = (x @ wv).reshape(bs, s, num_heads, d_v).transpose(0, 2, 1, 3)
    attn = (q @ k.transpose(0, 1, 3, 2)) / jnp.sqrt(jnp.float32(d_v))
    if use_future_mask:
        row = jnp.arange(s)[:, None]
        col = jnp.arange(s)[None, :]
        attn = jnp.where(row < col, -100.0, attn)
    attn = jax.nn.softmax(attn, axis=-1)
    out = (attn @ v).transpose(0, 2, 1, 3).reshape(bs, s, d)
    return out @ wo


if __name__ == "__main__":
    bs, seq_len, d_model, num_heads = 2, 8, 32, 4

    key = jax.random.PRNGKey(0)
    kx, kq, kk, kv, ko = jax.random.split(key, 5)

    x = jax.random.normal(kx, (bs, seq_len, d_model), dtype=jnp.float32)
    # Deterministic nn.Linear(d_model, d_model, bias=False)-style weights,
    # stored as (in, out) so y = x @ W.
    scale = 1.0 / jnp.sqrt(jnp.float32(d_model))
    wq = jax.random.uniform(kq, (d_model, d_model), jnp.float32, -scale, scale)
    wk = jax.random.uniform(kk, (d_model, d_model), jnp.float32, -scale, scale)
    wv = jax.random.uniform(kv, (d_model, d_model), jnp.float32, -scale, scale)
    wo = jax.random.uniform(ko, (d_model, d_model), jnp.float32, -scale, scale)

    # One-time weight restructure / bf16 cast (hoisted out of the per-call path).
    weights = prepare_attention_weights(wq, wk, wv, wo, num_heads=num_heads)

    # bf16 MXU operands + approx reciprocal: compare against the f32 reference
    # with a correspondingly relaxed tolerance (standard flash-attn tradeoff;
    # keep f32 accumulation and re-tighten if this ever feeds training).
    tol = dict(atol=2e-2, rtol=2e-2)

    for mask in (False, True):
        out = attention_pallas(x, weights, num_heads=num_heads,
                               use_future_mask=mask)
        out = jax.block_until_ready(out)
        ref = attention_ref(x, wq, wk, wv, wo, num_heads=num_heads,
                            use_future_mask=mask)
        assert out.shape == (bs, seq_len, d_model)
        assert jnp.allclose(out, ref, **tol), f"mismatch vs reference (mask={mask})"

    print("KERNEL_OK")
</pallas_src>

<mosaic_0001>
module attributes {stable_mosaic.version = 11 : i64} {
  func.func @_flash_attention_kernel(%arg0: i32, %arg1: i32, %arg2: i32, %arg3: i32, %arg4: memref<1x8x32xbf16, #tpu.memory_space<vmem>>, %arg5: memref<1x8x32xbf16, #tpu.memory_space<vmem>>, %arg6: memref<1x32x8xbf16, #tpu.memory_space<vmem>>, %arg7: memref<1x32x8xbf16, #tpu.memory_space<vmem>>, %arg8: memref<1x32x8xbf16, #tpu.memory_space<vmem>>, %arg9: memref<1x8x32xbf16, #tpu.memory_space<vmem>>, %arg10: memref<1x8x32xf32, #tpu.memory_space<vmem>>, %arg11: memref<8x8xbf16, #tpu.memory_space<vmem>>, %arg12: memref<8x1xf32, #tpu.memory_space<vmem>>, %arg13: memref<8x1xf32, #tpu.memory_space<vmem>>, %arg14: memref<8x8xf32, #tpu.memory_space<vmem>>, %arg15: memref<8x32xf32, #tpu.memory_space<vmem>>) attributes {dimension_semantics = [#tpu.dimension_semantics<parallel>, #tpu.dimension_semantics<parallel>, #tpu.dimension_semantics<arbitrary>, #tpu.dimension_semantics<arbitrary>], iteration_bounds = array<i64: 2, 1, 4, 1>, scalar_prefetch = 0 : i64, scratch_operands = 5 : i64, tpu.core_type = #tpu.core_type<tc>, window_params = [{transform_indices = @transform_0, window_bounds = array<i64: 1, 8, 32>}, {transform_indices = @transform_1, window_bounds = array<i64: 1, 8, 32>}, {transform_indices = @transform_2, window_bounds = array<i64: 1, 32, 8>}, {transform_indices = @transform_3, window_bounds = array<i64: 1, 32, 8>}, {transform_indices = @transform_4, window_bounds = array<i64: 1, 32, 8>}, {transform_indices = @transform_5, window_bounds = array<i64: 1, 8, 32>}, {transform_indices = @transform_6, window_bounds = array<i64: 1, 8, 32>}]} {
    %c0_i32 = arith.constant 0 : i32
    %0 = arith.cmpi eq, %arg2, %c0_i32 : i32
    %c0_i32_0 = arith.constant 0 : i32
    %1 = arith.cmpi eq, %arg3, %c0_i32_0 : i32
    %2 = arith.andi %0, %1 : i1
    %3 = arith.extui %2 : i1 to i32
    %c0_i32_1 = arith.constant 0 : i32
    %4 = arith.cmpi ne, %3, %c0_i32_1 : i32
    scf.if %4 {
      %cst_35 = arith.constant 0.000000e+00 : f32
      %51 = vector.broadcast %cst_35 : f32 to vector<8x32xf32>
      %c0_36 = arith.constant 0 : index
      %c0_37 = arith.constant 0 : index
      %52 = vector.load %arg15[%c0_36, %c0_37] : memref<8x32xf32, #tpu.memory_space<vmem>>, vector<8x32xf32>
      tpu.vector_store %arg15[%c0_36, %c0_37], %51 {strides = array<i32>} : memref<8x32xf32, #tpu.memory_space<vmem>>, vector<8x32xf32>,
    } else {
    }
    %c0_i32_2 = arith.constant 0 : i32
    %5 = arith.cmpi eq, %arg3, %c0_i32_2 : i32
    %6 = arith.extui %5 : i1 to i32
    %c0_i32_3 = arith.constant 0 : i32
    %7 = arith.cmpi ne, %6, %c0_i32_3 : i32
    scf.if %7 {
      %c0_35 = arith.constant 0 : index
      %c0_36 = arith.constant 0 : index
      %c0_37 = arith.constant 0 : index
      %51 = vector.load %arg4[%c0_35, %c0_36, %c0_37] : memref<1x8x32xbf16, #tpu.memory_space<vmem>>, vector<1x8x32xbf16>
      %52 = vector.shape_cast %51 : vector<1x8x32xbf16> to vector<8x32xbf16>
      %c0_38 = arith.constant 0 : index
      %c0_39 = arith.constant 0 : index
      %c0_40 = arith.constant 0 : index
      %53 = vector.load %arg6[%c0_38, %c0_39, %c0_40] : memref<1x32x8xbf16, #tpu.memory_space<vmem>>, vector<1x32x8xbf16>
      %54 = vector.shape_cast %53 : vector<1x32x8xbf16> to vector<32x8xbf16>
      %cst_41 = arith.constant dense<0.000000e+00> : vector<8x8xf32>
      %55 = tpu.matmul %52, %54, %cst_41 {dimension_numbers = #tpu.dot_dimension_numbers<[1], [0], [0], [1], [0, 0, 1, 1], [], []>} : vector<8x32xbf16>, vector<32x8xbf16>, vector<8x8xf32> -> vector<8x8xf32>
      %cst_42 = arith.constant 0.353553385 : f32
      %56 = vector.broadcast %cst_42 : f32 to vector<8x8xf32>
      %57 = arith.mulf %55, %56 : vector<8x8xf32>
      %58 = arith.truncf %57 : vector<8x8xf32> to vector<8x8xbf16>
      %c0_43 = arith.constant 0 : index
      %c0_44 = arith.constant 0 : index
      %59 = vector.load %arg11[%c0_43, %c0_44] : memref<8x8xbf16, #tpu.memory_space<vmem>>, vector<8x8xbf16>
      tpu.vector_store %arg11[%c0_43, %c0_44], %58 {strides = array<i32>} : memref<8x8xbf16, #tpu.memory_space<vmem>>, vector<8x8xbf16>,
      %cst_45 = arith.constant 0xFF800000 : f32
      %60 = vector.broadcast %cst_45 : f32 to vector<8x1xf32>
      %c0_46 = arith.constant 0 : index
      %c0_47 = arith.constant 0 : index
      %61 = vector.load %arg12[%c0_46, %c0_47] : memref<8x1xf32, #tpu.memory_space<vmem>>, vector<8x1xf32>
      tpu.vector_store %arg12[%c0_46, %c0_47], %60 {strides = array<i32>} : memref<8x1xf32, #tpu.memory_space<vmem>>, vector<8x1xf32>,
      %cst_48 = arith.constant 0.000000e+00 : f32
      %62 = vector.broadcast %cst_48 : f32 to vector<8x1xf32>
      %c0_49 = arith.constant 0 : index
      %c0_50 = arith.constant 0 : index
      %63 = vector.load %arg13[%c0_49, %c0_50] : memref<8x1xf32, #tpu.memory_space<vmem>>, vector<8x1xf32>
      tpu.vector_store %arg13[%c0_49, %c0_50], %62 {strides = array<i32>} : memref<8x1xf32, #tpu.memory_space<vmem>>, vector<8x1xf32>,
      %cst_51 = arith.constant 0.000000e+00 : f32
      %64 = vector.broadcast %cst_51 : f32 to vector<8x8xf32>
      %c0_52 = arith.constant 0 : index
      %c0_53 = arith.constant 0 : index
      %65 = vector.load %arg14[%c0_52, %c0_53] : memref<8x8xf32, #tpu.memory_space<vmem>>, vector<8x8xf32>
      tpu.vector_store %arg14[%c0_52, %c0_53], %64 {strides = array<i32>} : memref<8x8xf32, #tpu.memory_space<vmem>>, vector<8x8xf32>,
    } else {
    }
    %c0 = arith.constant 0 : index
    %c0_4 = arith.constant 0 : index
    %c0_5 = arith.constant 0 : index
    %8 = vector.load %arg5[%c0, %c0_4, %c0_5] : memref<1x8x32xbf16, #tpu.memory_space<vmem>>, vector<1x8x32xbf16>
    %9 = vector.shape_cast %8 : vector<1x8x32xbf16> to vector<8x32xbf16>
    %c0_6 = arith.constant 0 : index
    %c0_7 = arith.constant 0 : index
    %c0_8 = arith.constant 0 : index
    %10 = vector.load %arg7[%c0_6, %c0_7, %c0_8] : memref<1x32x8xbf16, #tpu.memory_space<vmem>>, vector<1x32x8xbf16>
    %11 = vector.shape_cast %10 : vector<1x32x8xbf16> to vector<32x8xbf16>
    %cst = arith.constant dense<0.000000e+00> : vector<8x8xf32>
    %12 = tpu.matmul %9, %11, %cst {dimension_numbers = #tpu.dot_dimension_numbers<[1], [0], [0], [1], [0, 0, 1, 1], [], []>} : vector<8x32xbf16>, vector<32x8xbf16>, vector<8x8xf32> -> vector<8x8xf32>
    %c0_9 = arith.constant 0 : index
    %c0_10 = arith.constant 0 : index
    %c0_11 = arith.constant 0 : index
    %13 = vector.load %arg8[%c0_9, %c0_10, %c0_11] : memref<1x32x8xbf16, #tpu.memory_space<vmem>>, vector<1x32x8xbf16>
    %14 = vector.shape_cast %13 : vector<1x32x8xbf16> to vector<32x8xbf16>
    %cst_12 = arith.constant dense<0.000000e+00> : vector<8x8xf32>
    %15 = tpu.matmul %9, %14, %cst_12 {dimension_numbers = #tpu.dot_dimension_numbers<[1], [0], [0], [1], [0, 0, 1, 1], [], []>} : vector<8x32xbf16>, vector<32x8xbf16>, vector<8x8xf32> -> vector<8x8xf32>
    %c0_13 = arith.constant 0 : index
    %c0_14 = arith.constant 0 : index
    %16 = vector.load %arg11[%c0_13, %c0_14] : memref<8x8xbf16, #tpu.memory_space<vmem>>, vector<8x8xbf16>
    %17 = arith.truncf %12 : vector<8x8xf32> to vector<8x8xbf16>
    %cst_15 = arith.constant dense<0.000000e+00> : vector<8x8xf32>
    %18 = tpu.matmul %16, %17, %cst_15 {dimension_numbers = #tpu.dot_dimension_numbers<[1], [1], [0], [0], [0, 0, 1, 0], [], []>} : vector<8x8xbf16>, vector<8x8xbf16>, vector<8x8xf32> -> vector<8x8xf32>
    %c0_16 = arith.constant 0 : index
    %c0_17 = arith.constant 0 : index
    %19 = vector.load %arg12[%c0_16, %c0_17] : memref<8x1xf32, #tpu.memory_space<vmem>>, vector<8x1xf32>
    %cst_18 = arith.constant dense<0xFF800000> : vector<8xf32>
    %20 = vector.multi_reduction <maximumf>, %18, %cst_18 [1] : vector<8x8xf32> to vector<8xf32>
    %21 = vector.shape_cast %20 : vector<8xf32> to vector<8x1xf32>
    %22 = arith.maximumf %19, %21 : vector<8x1xf32>
    %23 = arith.subf %19, %22 : vector<8x1xf32>
    %24 = math.exp %23 : vector<8x1xf32>
    %25 = vector.broadcast %22 : vector<8x1xf32> to vector<8x8xf32>
    %26 = arith.subf %18, %25 : vector<8x8xf32>
    %27 = math.exp %26 : vector<8x8xf32>
    %c0_19 = arith.constant 0 : index
    %c0_20 = arith.constant 0 : index
    %28 = vector.load %arg13[%c0_19, %c0_20] : memref<8x1xf32, #tpu.memory_space<vmem>>, vector<8x1xf32>
    %29 = arith.mulf %24, %28 : vector<8x1xf32>
    %cst_21 = arith.constant dense<0.000000e+00> : vector<8xf32>
    %30 = vector.multi_reduction <add>, %27, %cst_21 [1] : vector<8x8xf32> to vector<8xf32>
    %31 = vector.shape_cast %30 : vector<8xf32> to vector<8x1xf32>
    %32 = arith.addf %29, %31 : vector<8x1xf32>
    %c0_22 = arith.constant 0 : index
    %c0_23 = arith.constant 0 : index
    %33 = vector.load %arg13[%c0_22, %c0_23] : memref<8x1xf32, #tpu.memory_space<vmem>>, vector<8x1xf32>
    tpu.vector_store %arg13[%c0_22, %c0_23], %32 {strides = array<i32>} : memref<8x1xf32, #tpu.memory_space<vmem>>, vector<8x1xf32>,
    %c0_24 = arith.constant 0 : index
    %c0_25 = arith.constant 0 : index
    %34 = vector.load %arg14[%c0_24, %c0_25] : memref<8x8xf32, #tpu.memory_space<vmem>>, vector<8x8xf32>
    %35 = vector.broadcast %24 : vector<8x1xf32> to vector<8x8xf32>
    %36 = arith.mulf %35, %34 : vector<8x8xf32>
    %37 = arith.truncf %27 : vector<8x8xf32> to vector<8x8xbf16>
    %38 = arith.truncf %15 : vector<8x8xf32> to vector<8x8xbf16>
    %cst_26 = arith.constant dense<0.000000e+00> : vector<8x8xf32>
    %39 = tpu.matmul %37, %38, %cst_26 {dimension_numbers = #tpu.dot_dimension_numbers<[1], [0], [0], [1], [0, 0, 1, 1], [], []>} : vector<8x8xbf16>, vector<8x8xbf16>, vector<8x8xf32> -> vector<8x8xf32>
    %40 = arith.addf %36, %39 : vector<8x8xf32>
    %c0_27 = arith.constant 0 : index
    %c0_28 = arith.constant 0 : index
    %41 = vector.load %arg14[%c0_27, %c0_28] : memref<8x8xf32, #tpu.memory_space<vmem>>, vector<8x8xf32>
    tpu.vector_store %arg14[%c0_27, %c0_28], %40 {strides = array<i32>} : memref<8x8xf32, #tpu.memory_space<vmem>>, vector<8x8xf32>,
    %c0_29 = arith.constant 0 : index
    %c0_30 = arith.constant 0 : index
    %42 = vector.load %arg12[%c0_29, %c0_30] : memref<8x1xf32, #tpu.memory_space<vmem>>, vector<8x1xf32>
    tpu.vector_store %arg12[%c0_29, %c0_30], %22 {strides = array<i32>} : memref<8x1xf32, #tpu.memory_space<vmem>>, vector<8x1xf32>,
    %c0_i32_31 = arith.constant 0 : i32
    %43 = arith.cmpi eq, %arg3, %c0_i32_31 : i32
    %44 = arith.extui %43 : i1 to i32
    %c0_i32_32 = arith.constant 0 : i32
    %45 = arith.cmpi ne, %44, %c0_i32_32 : i32
    scf.if %45 {
      %c0_35 = arith.constant 0 : index
      %c0_36 = arith.constant 0 : index
      %51 = vector.load %arg14[%c0_35, %c0_36] : memref<8x8xf32, #tpu.memory_space<vmem>>, vector<8x8xf32>
      %c0_37 = arith.constant 0 : index
      %c0_38 = arith.constant 0 : index
      %52 = vector.load %arg13[%c0_37, %c0_38] : memref<8x1xf32, #tpu.memory_space<vmem>>, vector<8x1xf32>
      %53 = tpu.reciprocal %52 {approx = true} : vector<8x1xf32> -> vector<8x1xf32>
      %54 = vector.broadcast %53 : vector<8x1xf32> to vector<8x8xf32>
      %55 = arith.mulf %51, %54 : vector<8x8xf32>
      %c0_39 = arith.constant 0 : index
      %c0_40 = arith.constant 0 : index
      %56 = vector.load %arg15[%c0_39, %c0_40] : memref<8x32xf32, #tpu.memory_space<vmem>>, vector<8x32xf32>
      %57 = arith.truncf %55 : vector<8x8xf32> to vector<8x8xbf16>
      %c0_41 = arith.constant 0 : index
      %c0_42 = arith.constant 0 : index
      %c0_43 = arith.constant 0 : index
      %58 = vector.load %arg9[%c0_41, %c0_42, %c0_43] : memref<1x8x32xbf16, #tpu.memory_space<vmem>>, vector<1x8x32xbf16>
      %59 = vector.shape_cast %58 : vector<1x8x32xbf16> to vector<8x32xbf16>
      %cst_44 = arith.constant dense<0.000000e+00> : vector<8x32xf32>
      %60 = tpu.matmul %57, %59, %cst_44 {dimension_numbers = #tpu.dot_dimension_numbers<[1], [0], [0], [1], [0, 0, 1, 1], [], []>} : vector<8x8xbf16>, vector<8x32xbf16>, vector<8x32xf32> -> vector<8x32xf32>
      %61 = arith.addf %56, %60 : vector<8x32xf32>
      %c0_45 = arith.constant 0 : index
      %c0_46 = arith.constant 0 : index
      %62 = vector.load %arg15[%c0_45, %c0_46] : memref<8x32xf32, #tpu.memory_space<vmem>>, vector<8x32xf32>
      tpu.vector_store %arg15[%c0_45, %c0_46], %61 {strides = array<i32>} : memref<8x32xf32, #tpu.memory_space<vmem>>, vector<8x32xf32>,
    } else {
    }
    %c0_i32_33 = arith.constant 0 : i32
    %46 = arith.cmpi eq, %arg3, %c0_i32_33 : i32
    %c3_i32 = arith.constant 3 : i32
    %47 = arith.cmpi eq, %arg2, %c3_i32 : i32
    %48 = arith.andi %46, %47 : i1
    %49 = arith.extui %48 : i1 to i32
    %c0_i32_34 = arith.constant 0 : i32
    %50 = arith.cmpi ne, %49, %c0_i32_34 : i32
    scf.if %50 {
      %c0_35 = arith.constant 0 : index
      %c0_36 = arith.constant 0 : index
      %51 = vector.load %arg15[%c0_35, %c0_36] : memref<8x32xf32, #tpu.memory_space<vmem>>, vector<8x32xf32>
      %c0_37 = arith.constant 0 : index
      %c0_38 = arith.constant 0 : index
      %c0_39 = arith.constant 0 : index
      %52 = vector.load %arg10[%c0_37, %c0_38, %c0_39] : memref<1x8x32xf32, #tpu.memory_space<vmem>>, vector<1x8x32xf32>
      %53 = vector.shape_cast %52 : vector<1x8x32xf32> to vector<8x32xf32>
      %54 = vector.shape_cast %51 : vector<8x32xf32> to vector<1x8x32xf32>
      tpu.vector_store %arg10[%c0_37, %c0_38, %c0_39], %54 {strides = array<i32>} : memref<1x8x32xf32, #tpu.memory_space<vmem>>, vector<1x8x32xf32>,
    } else {
    }
    return
  }
  func.func @transform_0(%arg0: i32, %arg1: i32, %arg2: i32, %arg3: i32) -> (i32, i32, i32) {
    %c0_i32 = arith.constant 0 : i32
    %c0_i32_0 = arith.constant 0 : i32
    return %arg0, %arg1, %c0_i32 : i32, i32, i32
  }
  func.func @transform_1(%arg0: i32, %arg1: i32, %arg2: i32, %arg3: i32) -> (i32, i32, i32) {
    %c0_i32 = arith.constant 0 : i32
    %c0_i32_0 = arith.constant 0 : i32
    return %arg0, %arg3, %c0_i32 : i32, i32, i32
  }
  func.func @transform_2(%arg0: i32, %arg1: i32, %arg2: i32, %arg3: i32) -> (i32, i32, i32) {
    %c0_i32 = arith.constant 0 : i32
    %c0_i32_0 = arith.constant 0 : i32
    %c0_i32_1 = arith.constant 0 : i32
    return %arg2, %c0_i32, %c0_i32_0 : i32, i32, i32
  }
  func.func @transform_3(%arg0: i32, %arg1: i32, %arg2: i32, %arg3: i32) -> (i32, i32, i32) {
    %c0_i32 = arith.constant 0 : i32
    %c0_i32_0 = arith.constant 0 : i32
    %c0_i32_1 = arith.constant 0 : i32
    return %arg2, %c0_i32, %c0_i32_0 : i32, i32, i32
  }
  func.func @transform_4(%arg0: i32, %arg1: i32, %arg2: i32, %arg3: i32) -> (i32, i32, i32) {
    %c0_i32 = arith.constant 0 : i32
    %c0_i32_0 = arith.constant 0 : i32
    %c0_i32_1 = arith.constant 0 : i32
    return %arg2, %c0_i32, %c0_i32_0 : i32, i32, i32
  }
  func.func @transform_5(%arg0: i32, %arg1: i32, %arg2: i32, %arg3: i32) -> (i32, i32, i32) {
    %c0_i32 = arith.constant 0 : i32
    %c0_i32_0 = arith.constant 0 : i32
    %c0_i32_1 = arith.constant 0 : i32
    return %arg2, %c0_i32, %c0_i32_0 : i32, i32, i32
  }
  func.func @transform_6(%arg0: i32, %arg1: i32, %arg2: i32, %arg3: i32) -> (i32, i32, i32) {
    %c0_i32 = arith.constant 0 : i32
    %c0_i32_0 = arith.constant 0 : i32
    return %arg0, %arg1, %c0_i32 : i32, i32, i32
  }
}

</mosaic_0001>

<bundles_post_ra>
// kernel: tpu_custom_call.1
= control target key start
LH: loop header
LB: loop body
LE: loop exit
PB: predicated region body
PF: predicated region fallthrough
CT: control target
= control target key end

     0   :  { %11 = vsyncpa [#allocation8], 0  ;;  %s1244_s0 = inlined_call_operand.vmem [shape: bf16[2,8,32], index: 0, kind: input, shape index: {}]   ;;  %s1245_s1 = inlined_call_operand.vmem [shape: bf16[2,8,32], index: 1, kind: input, shape index: {}]   ;;  %s1246_s2 = inlined_call_operand.vmem [shape: bf16[4,32,8], index: 2, kind: input, shape index: {}]   ;;  %s1247_s3 = inlined_call_operand.vmem [shape: bf16[4,32,8], index: 3, kind: input, shape index: {}]   ;;  %s1248_s4 = inlined_call_operand.vmem [shape: bf16[4,32,8], index: 4, kind: input, shape index: {}]   ;;  %s1249_s5 = inlined_call_operand.vmem [shape: bf16[4,8,32], index: 5, kind: input, shape index: {}]   ;;  %s1250_s6 = inlined_call_operand.hbm [shape: f32[2,8,32], index: 6, kind: output, shape index: {}]  }
   0x1   :  { %13 = vsyncpa [#allocation8 + $0x1], 0  ;;  %s1071_s21 = smov 0   ;;  %s1073_s22 = smov 0  }
   0x2   :  { %s1075_s23 = smov 0   ;;  %s1077_s24 = smov 0  }
   0x3   :  { %s1079_s25 = smov 0   ;;  %s1081_s26 = smov 0  }
   0x4   :  { %s1083_s27 = smov 0   ;;  %s1085_s28 = smov 0  }
   0x5 LB: > { %1260 = sst [smem:[#allocation10_spill]] %s1002_s21  ;;  %s790_s29 = sadd.s32 4294967295, %s1030_s28   ;;  %s1030_s28 = sphi %s1085_s28, %s19_s28   ;;  %s1026_s27 = sphi %s1083_s27, %s1280_s27   ;;  %s1022_s26 = sphi %s1081_s26, %s1279_s26   ;;  %s1018_s25 = sphi %s1079_s25, %s1278_s25   ;;  %s1014_s24 = sphi %s1077_s24, %s1277_s24   ;;  %s1010_s23 = sphi %s1075_s23, %s1276_s23   ;;  %s1006_s22 = sphi %s1073_s22, %s1282_s22   ;;  %s1002_s21 = sphi %s1071_s21, %s1281_s21  }
   0x6   : > { %1261 = sst [smem:[#allocation11_spill]] %s1010_s23  ;;  %s791_s30 = sadd.s32 4294967294, %s1030_s28  }
   0x7   : > { %1262 = sst [smem:[#allocation12_spill]] %s1022_s26  ;;  %s37_s7 = sadd.s32 1, %s1022_s26 }
   0x8   : > { %1263 = sst [smem:[#allocation13_spill]] %s1026_s27  ;;  %p39_p0 = scmp.ge.s32.totalorder %s37_s7, 4 }
   0x9   : > { %1264 = sst [smem:[#allocation14_spill]] %s1030_s28  ;;  %s45_s8 = sadd.s32 1, %s1026_s27 }
   0xa   : > { %p224_p1 = scmp.ne.s32.totalorder %s1010_s23, %s1006_s22  ;;  %p225_p2 = scmp.eq.s32.totalorder %s790_s29, 7 }
   0xb   : > { %s1284_s7 = smov (%p39_p0, %s37_s7), 0  ;;  %s1286_s8 = smov (!%p39_p0, %s45_s8), %s1026_s27 }
   0xc   : > { %1265 = sst [smem:[#allocation15_spill]] %s1284_s7  ;;  %p1120_p3 = por %p225_p2, %p224_p1 }
   0xd   : > { %p230_p4 = scmp.ne.s32.totalorder %s1006_s22, %s1002_s21  ;;  %p47_p5 = scmp.ge.s32.totalorder %s1286_s8, 2 }
   0xe   : > { %p231_p6 = scmp.eq.s32.totalorder %s791_s30, 7  ;;  %p794_p7 = scmp.ge.s32.totalorder %s1030_s28, 1 }
   0xf   : > { %p300_p8 = scmp.lt.s32.totalorder %s1030_s28, 9  ;;  %s1288_s8 = smov (%p47_p5, %s1286_s8), 0 }
  0x10   : > { %1267 = sst [smem:[#allocation16_spill]] %s1288_s8  ;;  %p1130_p9 = por %p231_p6, %p230_p4 }
  0x11   : > { %p301_p10 = pnand %p794_p7, %p300_p8  ;;  %s209_s11 = ssub.s32 %s1026_s27, %s1288_s8 }
  0x12   : > { %s1268_s10 = scalar_select %p1130_p9, 1, 0 }
  0x13   : > { %s214_s12 = sadd.s32 1, %s1010_s23  ;;  %p212_p11 = scmp.eq.s32.totalorder %s209_s11, 0 }
  0x14   : > { %1269 = sst [smem:[#allocation17_spill]] %s1268_s10  ;;  %304 = sbr.rel (%p301_p10) target bundleno = 941 (0x3ad), region = 44 }
  0x15   : > { %s1138_s13 = scalar_select %p212_p11, %s1010_s23, %s214_s12  }
  0x16   : > { %s1254_s14 = sand.u32 (!%p301_p10), 1, %s1006_s22   ;;  %p358_p12 = scmp.lt.s32.totalorder (!%p301_p10), %s1018_s25, 1 }
  0x17   : > { %1270 = sst [smem:[#allocation18_spill]] %s1138_s13  ;;  %s1144_s15 = sshll.u32 (!%p301_p10), %s1254_s14, 3 }
  0x18   : > { %p372_p13 = scmp.lt.s32.totalorder (!%p301_p10), %s1014_s24, 3  ;;  %p392_p0 = scmp.eq.s32.totalorder (!%p301_p10), %s1014_s24, 0 }
  0x19   : > { %s359_s16 = scalar_select %p358_p12, %s1018_s25, 1  ;;  %vm398_vm0 = vcmask (%p392_p0), 261120   ;;  %v1032_v0 = vmov (%p392_p0), 0.0  }
  0x1a   : > { %s373_s17 = scalar_select %p372_p13, %s1014_s24, 3  ;;  %399 = vst.msk [vmem:[#allocation6] sm:$0xff] (%p392_p0), %vm398_vm0, %v1032_v0 }
  0x1b   : > { %s796_s18 = sshll.u32 %s359_s16, 2 }
  0x1c   : > { %s364_s29 = scalar_lea.vmem %s1244_s0, %s796_s18  ;;  %s371_s12 = scalar_lea.vmem %s1245_s1, %s796_s18 }
  0x1d   : > { %s841_s8 = sshll.u32 %s373_s17, 4  ;;  %s804_s7 = sshll.u32 %s373_s17, 2 }
  0x1e   : > { %s376_s14 = scalar_lea.vmem %s1246_s2, %s841_s8  ;;  %s381_s10 = scalar_lea.vmem %s1247_s3, %s841_s8 }
  0x1f   : > { %s1165_s28 = scalar_lea.vmem %s1248_s4, %s841_s8  ;;  %s1170_s30 = scalar_lea.vmem %s1249_s5, %s804_s7 }
  0x20   : > { %s357_s18 = scalar_lea.vmem [#allocation7], %s1144_s15  ;;  %397 = sbr.rel (!%p392_p0) target bundleno = 37 (0x25), region = 48 }
  0x25 PF: > { %v846_v1 = vld [vmem:[%s376_s14 + $0x8] sm:$0xff]  ;;  %v845_v3 = vld [vmem:[%s376_s14] sm:$0xff]  ;;  %vm420_vm1 = vcmask 261120   ;;  %vm444_vm2 = vcmask 64512   ;;  %vm439_vm3 = vcmask 60416   ;;  %vm441_vm4 = vcmask 7168  }
  0x26   : > { %v848_v2 = vld [vmem:[%s381_s10 + $0x8] sm:$0xff]  ;;  %430 = vmatpush.bf16.msra.mxu0 %v846_v1  ;;  %v847_v4 = vld [vmem:[%s381_s10] sm:$0xff]  ;;  %v1033_v17 = vmov -inf   ;;  %v1034_v22 = vmov 0   ;;  %v1035_v23 = vmov 0.0   ;;  %vm567_vm5 = vcmask 1043456  }
  0x27   : > { %473 = vmatpush.bf16.msra.mxu1 %v848_v2  ;;  %v403_v5 = vld [vmem:[%s364_s29] sm:$0xf]  ;;  %v850_v16 = vld [vmem:[%s1165_s28 + $0x8] sm:$0xff]  ;;  %442 = vst.msk [vmem:[#allocation3] sm:$0xff] %vm441_vm4, %v1033_v17  ;;  %927 = vset.pattern.permute.xlu0 %v1034_v22  ;;  %p623_p1 = scmp.eq.s32.totalorder %s1014_s24, 3 }
  0x28   : > { %v446_v6 = vld [vmem:[%s371_s12] sm:$0xf]  ;;  %502 = vmatpush.bf16.msra.mxu2 %v850_v16  ;;  %928 = vset.pattern.permute.xlu1 %v1034_v22  ;;  %443 = vst.msk [vmem:[#allocation4] sm:$0xff] %vm441_vm4, %v1035_v23 }
  0x29   : > { %v849_v18 = vld [vmem:[%s1165_s28] sm:$0xff]  ;;  %929 = vset.pattern.permute.xlu2 %v1034_v22  ;;  %445 = vst.msk [vmem:[#allocation5] sm:$0xff] %vm444_vm2, %v1035_v23 }
  0x2a   : > { %431 = vmatpush.bf16.msra.mxu0 %v845_v3  ;;  %v601_v41 = vld [vmem:[%s1170_s30] sm:$0xf] }
  0x2b   : > { %474 = vmatpush.bf16.msra.mxu1 %v847_v4  ;;  %v606_v42 = vsel %vm567_vm5, %v601_v41, 0  ;;  %v599_v58 = vld [vmem:[#allocation6] sm:$0xff] }
  0x2c   : > { %503 = vmatpush.bf16.msra.mxu2 %v849_v18 }
  0x2d   : > { %814 = vmatmul.msk.bf16.vlgmr.msra.gmra.mxu0 %vm420_vm1, %v403_v5 }
  0x2e   : > { %823 = vmatmul.msk.bf16.vlgmr.msra.gmra.mxu1 %vm420_vm1, %v446_v6  ;;  %v531_v24 = vld [vmem:[#allocation3] sm:$0xff] }
  0x2f   : > { %832 = vmatmul.msk.bf16.vlgmr.msra.gmra.mxu2 %vm420_vm1, %v446_v6  ;;  %v547_v40 = vld [vmem:[#allocation4] sm:$0xff]  ;;  %615 = vmatpush.bf16.msrb.mxu1 %v606_v42 }
  0x30   : > { %v555_v50 = vld [vmem:[#allocation5] sm:$0xff] }
  0xaa   : > { %v433_v7 = vpop.f32.mrf.mxu0 }
  0xab   : > { %v476_v8 = vpop.f32.mrf.mxu1  ;;  %v437_v9 = vmul.f32 0.35355338, %v433_v7 }
  0xac   : > { %v510_v10 = vpack.c.bf16 %v476_v8, %v476_v8 }
  0xad   : > { %v438_v11 = vpack.c.bf16 %v437_v9, %v437_v9 }
  0xae   : > { %v516_v12 = vsel %vm444_vm2, %v510_v10, 0 }
  0xaf   : > { %525 = vmatpush.bf16.xpose.msra.mxu3 %v516_v12  ;;  %440 = vst.msk [vmem:[#allocation2] sm:$0xf] %vm439_vm3, %v438_v11 }
  0xb2   : > { %v435_v13 = vpop.f32.mrf.mxu0  ;;  %v505_v28 = vpop.f32.mrf.mxu2 }
  0xb3   : > { %v478_v14 = vpop.f32.mrf.mxu1  ;;  %v563_v29 = vpack.c.bf16 %v505_v28, %v505_v28 }
  0xb5   : > { %v569_v30 = vsel %vm567_vm5, %v563_v29, 0 }
  0xb6   : > { %v509_v15 = vld [vmem:[#allocation2] sm:$0xf]  ;;  %578 = vmatpush.bf16.msrb.mxu0 %v569_v30 }
  0xb7   : > { %833 = vmatmul.msk.bf16.vlgmr.msra.gmra.mxu3 %vm444_vm2, %v509_v15 }
  0xba   : > { %v507_v31 = vpop.f32.mrf.mxu2 }
 0x13a   : > { %v527_v19 = vpop.f32.mrf.mxu3 }
 0x13b   : > { %v532_v20 = vsel %vm444_vm2, %v527_v19, -inf }
 0x13c   : > { %533 = vmax.xlane.f32.xlu0 %v532_v20 }
 0x142   : > { %v529_v21 = vpop.f32.mrf.mxu3 }
 0x1af   : > { %v534_v25 = vpop.xlane.xlu0 %533 }
 0x1b0   : > { %v535_v26 = vmax.f32 %v531_v24, %v534_v25 }
 0x1b2   : > { %v536_v27 = vsub.f32 %v531_v24, %v535_v26  ;;  %586 = vst.msk [vmem:[#allocation3] sm:$0xff] %vm441_vm4, %v535_v26  ;;  %541 = vperm.xlu0 %927, %v535_v26  }
 0x1b4   : > { %v537_v38 = vmul.f32 1.442695, %v536_v27 }
 0x224   : > { %v542_v32 = vpop.permute.xlu0 %541 }
 0x225   : > { %v544_v33 = vsub.f32 %v527_v19, %v542_v32 }
 0x227   : > { %v545_v34 = vmul.f32 1.442695, %v544_v33 }
 0x229   : > { %930 = vpow2.f32 %v545_v34 }
 0x22a   : > { %932 = vpow2.f32 %v537_v38 }
 0x22f   : > { %v931_v35 = vpop.eup %930 }
 0x230   : > { %v549_v36 = vsel %vm444_vm2, %v931_v35, 0.0  ;;  %v562_v37 = vpack.c.bf16 %v931_v35, %v931_v35  ;;  %v933_v39 = vpop.eup %932 }
 0x231   : > { %550 = vadd.xlane.f32.xlu1 %v549_v36  ;;  %v548_v43 = vmul.f32 %v933_v39, %v547_v40 }
 0x232   : > { %834 = vmatmul.msk.bf16.vlgmr.msrb.gmra.mxu0 %vm444_vm2, %v562_v37 }
 0x24a   : > { %558 = vperm.xlu1 %928, %v933_v39  }
 0x2a4   : > { %v551_v44 = vpop.xlane.xlu1 %550 }
 0x2a5   : > { %v552_v45 = vadd.f32 %v551_v44, %v548_v43 }
 0x2a7   : > { %554 = vst.msk [vmem:[#allocation4] sm:$0xff] %vm441_vm4, %v552_v45 }
 0x2ae   : > { %v591_v46 = vld [vmem:[#allocation4] sm:$0xff] }
 0x2af   : > { %v580_v47 = vpop.f32.mrf.mxu0  ;;  %934 = vrcp.f32 %v591_v46 }
 0x2b5   : > { %v935_v48 = vpop.eup %934 }
 0x2b6   : > { %595 = vperm.xlu2 %929, %v935_v48  }
 0x2b7   : > { %v582_v49 = vpop.f32.mrf.mxu0 }
 0x2bc   : > { %v559_v51 = vpop.permute.xlu1 %558 }
 0x2bd   : > { %v561_v52 = vmul.f32 %v559_v51, %v555_v50 }
 0x2bf   : > { %v584_v53 = vadd.f32 %v580_v47, %v561_v52 }
 0x2c1   : > { %585 = vst.msk [vmem:[#allocation5] sm:$0xff] %vm444_vm2, %v584_v53 }
 0x2c8   : > { %v590_v55 = vld [vmem:[#allocation5] sm:$0xff] }
 0x310   : > { %v596_v54 = vpop.permute.xlu2 %595 }
 0x311   : > { %v598_v56 = vmul.f32 %v596_v54, %v590_v55 }
 0x313   : > { %v600_v57 = vpack.c.bf16 %v598_v56, %v598_v56 }
 0x315   : > { %835 = vmatmul.msk.bf16.vlgmr.msrb.gmra.mxu1 %vm444_vm2, %v600_v57 }
 0x392   : > { %v617_v59 = vpop.f32.mrf.mxu1 }
 0x393   : > { %v621_v60 = vadd.f32 %v617_v59, %v599_v58 }
 0x395   : > { %622 = vst.msk [vmem:[#allocation6] sm:$0xff] %vm420_vm1, %v621_v60 }
 0x396   : > { %627 = sbr.rel (!%p623_p1) target bundleno = 926 (0x39e), region = 60 }
 0x39a   : > { %v619_v61 = vpop.f32.mrf.mxu1 }
 0x39c   : > { %v628_v62 = vld [vmem:[#allocation6] sm:$0xff] }
 0x39d   : > { %629 = vst.msk [vmem:[%s357_s18] sm:$0xff] %vm420_vm1, %v628_v62 }
 0x39e PF: > { %s838_s21 = sshll.u32 %s1018_s25, 3  ;;  %s644_s27 = sshll.u32 %s357_s18, 4  ;;  %s645_s27 = int_to_ptr.vmem [resolvable:$true] %s644_s27 }
 0x39f   : > { %s642_s26 = scalar_lea.hbm %s1250_s6, %s838_s21  ;;  %s1271_s7 = sand.u32 1, %s1006_s22  }
 0x3a0   : > { %s646_s28 = sshll.u32 %s642_s26, 4  ;;  %s631_s8 = scalar_lea.sflag [#allocation8], %s1271_s7  ;;  %s647_s28 = int_to_ptr.hbm [resolvable:$true] %s646_s28 }
 0x3a1   : > { %s950_s10 = sshra.s32 %s647_s28, 4  ;;  %s956_s17 = scalar_lea.hbm %s1250_s6, 16  ;;  %s951_s10 = int_to_ptr.hbm [resolvable:$true] %s950_s10 }
 0x3a2   : > { %s952_s13 = scalar_lea.hbm %s951_s10, 8  ;;  %p957_p6 = scmp.lt.s32.totalorder %s951_s10, %s1250_s6 }
 0x3a3   : > { %p953_p2 = scmp.ne.s32.totalorder %s951_s10, %s952_s13  ;;  %p958_p7 = scmp.lt.s32.totalorder %s956_s17, %s952_s13 }
 0x3a5   : > { %p954_p4 = pnand %p953_p2, %p1120_p3  ;;  %p959_p8 = por %p958_p7, %p957_p6 }
 0x3a7   : > { %p955_p5 = pneg %p954_p4 }
 0x3a9   : > { %p960_p10 = pnand %p959_p8, %p955_p5 }
 0x3ab   : > { %963 = shalt.err (!%p960_p10)
}
 0x3ac   : > { %852 = dma.vmem_to_hbm [thread:$0]  (%p1120_p3), %s645_s27, 128, %s647_s28, %s631_s8  }
 0x3ad PF: > { %s1272_s15 = sld [smem:[#allocation14_spill]] }
 0x3ae   : > { %s1273_s12 = sld [smem:[#allocation10_spill]] }
 0x3b3   : > { %p858_p11 = scmp.ge.s32.totalorder %s1272_s15, 2 }
 0x3b4   : > { %s658_s19 = sand.u32 1, %s1273_s12  }
 0x3b5   : > { %p855_p12 = pnand %p858_p11, %p1130_p9  ;;  %s659_s20 = scalar_lea.sflag [#allocation8], %s658_s19 }
 0x3b7   : > { %p856_p13 = pneg %p855_p12 }
 0x3b9   : > { %997 = dma.done.wait (%p856_p13), %s659_s20, 128  }
 0x3ba   : > { %999 = vsyncadd (%p856_p13), %s659_s20, 4294967168  ;;  %s19_s28 = sadd.s32 1, %s1272_s15   ;;  %s1275_s30 = sld [smem:[#allocation11_spill]] }
 0x3bb   : > { %p16_p0 = scmp.ge.s32.totalorder %s19_s28, 10   ;;  %s1276_s23 = sld [smem:[#allocation18_spill]] }
 0x3bc   : > { %s1277_s24 = sld [smem:[#allocation12_spill]]  ;;  %s1281_s21 = smov %s1006_s22 }
 0x3bd   : > { %s1278_s25 = sld [smem:[#allocation13_spill]]  ;;  %18 = sbr.rel (!%p16_p0) target bundleno = 5 (0x5), region = 110 }
 0x3be   : > { %s1279_s26 = sld [smem:[#allocation15_spill]] }
 0x3bf   : > { %s1280_s27 = sld [smem:[#allocation16_spill]] }
 0x3c0   : > { %s1282_s22 = smov %s1275_s30 }
 0x3c2   :  { %665 = vsyncpa [#allocation8], 1 }
 0x3c3   :  { %667 = vsyncpa [#allocation8 + $0x1], 1 }

</bundles_post_ra>
